<compile_context>
chip_gen: v5e
topology: v5e:2x2
jax: 0.10.0
libtpu: 0.0.40
codegen_flags: <defaults>
</compile_context>

<pallas_src>
import functools

import jax
import jax.numpy as jnp
from jax.experimental import pallas as pl
from jax.experimental.pallas import tpu as pltpu

INPUT_SIZE = 16      # R: length of the column vector fed to fc1
HIDDEN1 = 256        # hardcoded by `out.view(-1, 1, 256)` in the PyTorch code
HIDDEN2 = 32         # LSTM hidden size
NUM_CLASSES = 4
MIN_TILE = 256       # keep tiles >= this so the ~0.35us/grid-step overhead amortizes
TARGET_TILES = 4     # aim for >= this many tiles when P is large (v7x: 2 TCs)


def _round_up(n, m):
    return ((n + m - 1) // m) * m


def _cdiv(a, b):
    return -(-a // b)


def rnn_kernel(rows_ref, w1_ref, b1_ref, wih_ref, bg_ref, w3_ref, b3_ref, out_ref):
    # rows_ref: [TP, INPUT_SIZE] bf16; weights bf16 pre-transposed to [in, out];
    # biases f32; out_ref: [TP, NUM_CLASSES] f32.
    H = HIDDEN2

    # fc1 + ReLU1 (bf16 MXU inputs, f32 accumulation); bf16 cast fused into the ReLU pass.
    h1 = jnp.maximum(
        jnp.dot(rows_ref[...], w1_ref[...], preferred_element_type=jnp.float32)
        + b1_ref[...],
        0.0,
    ).astype(jnp.bfloat16)                                        # [TP, 256]

    # Single LSTM step from (h0, c0) = 0: W_hh term vanishes and the forget gate
    # multiplies c0 == 0, so wih_ref carries only the live [i | g | o] columns.
    # The g columns (and bias) are pre-scaled by 2, so ONE sigmoid over all 96 lanes
    # gives i and o directly and the cell candidate via tanh(x) = 2*sigmoid(2x) - 1.
    gates = (jnp.dot(h1, wih_ref[...], preferred_element_type=jnp.float32)
             + bg_ref[...])                                       # [TP, 96] f32
    s = jax.nn.sigmoid(gates)                                     # single EUP pass
    i_g = s[:, 0 * H:1 * H]                                       # input gate
    g_g = 2.0 * s[:, 1 * H:2 * H] - 1.0                           # cell candidate (VPU fixup)
    o_g = s[:, 2 * H:3 * H]                                       # output gate

    # h = o * tanh(c) with c = i * g;  ReLU2 and bf16 cast fused into one pass.
    h = jnp.maximum(o_g * jnp.tanh(i_g * g_g), 0.0).astype(jnp.bfloat16)   # [TP, 32]

    # fc3 + softmax over the 4 real classes only; narrow store (no padded writeback).
    logits = (jnp.dot(h, w3_ref[...], preferred_element_type=jnp.float32)
              + b3_ref[...])                                      # [TP, 4] f32
    m = jnp.max(logits, axis=-1, keepdims=True)
    e = jnp.exp(logits - m)
    ssum = jnp.sum(e, axis=-1, keepdims=True)
    out_ref[...] = e * pl.reciprocal(ssum, approx=True)


def prepare_kernel_params(params):
    """PyTorch-layout params -> kernel params (transposed, gate-pruned, g-scaled, bf16)."""
    (w1, b1, wih, _whh, bih, bhh, w3, b3) = params
    H = HIDDEN2
    # fc1: [out, in] -> [in, out]
    w1_t = w1.T.astype(jnp.bfloat16)                              # [16, 256]
    b1_r = b1.reshape(1, HIDDEN1).astype(jnp.float32)
    # LSTM (PyTorch gate order i, f, g, o); keep only live gates [i, g, o], fold biases,
    # and pre-scale the g gate by 2 (exact in bf16) for the fused-sigmoid trick.
    bsum = bih + bhh
    wih_t = jnp.concatenate(
        [wih[0 * H:1 * H], 2.0 * wih[2 * H:3 * H], wih[3 * H:4 * H]], axis=0
    ).T.astype(jnp.bfloat16)                                      # [256, 96]
    bg = jnp.concatenate(
        [bsum[0 * H:1 * H], 2.0 * bsum[2 * H:3 * H], bsum[3 * H:4 * H]]
    ).reshape(1, 3 * H).astype(jnp.float32)                       # [1, 96]
    # fc3: narrow (4-class) weights; no lane padding, no -inf pad bias needed.
    w3_t = w3.T.astype(jnp.bfloat16)                              # [32, 4]
    b3_r = b3.reshape(1, NUM_CLASSES).astype(jnp.float32)         # [1, 4]
    return (w1_t, b1_r, wih_t, bg, w3_t, b3_r)


def _choose_tile(P, tile_p):
    """Balanced patient tile: multiple of 16 sublanes (bf16), >= MIN_TILE when possible,
    and >= TARGET_TILES tiles for large P so v7x can shard across both TensorCores."""
    p16 = _round_up(max(P, 1), 16)
    if p16 <= MIN_TILE:
        return p16
    n_tiles = max(_cdiv(p16, tile_p), min(TARGET_TILES, p16 // MIN_TILE))
    return min(_round_up(_cdiv(p16, n_tiles), 16), tile_p)


@functools.partial(jax.jit, static_argnames=("tile_p",))
def rnn_forward(x, kparams, tile_p=1024):
    # Only the last row of the last transposed matrix per patient matters.
    rows = x[:, -1, :, -1].astype(jnp.bfloat16)                   # [P, INPUT_SIZE]
    P = rows.shape[0]
    tp = _choose_tile(P, tile_p)
    p_pad = _round_up(P, tp)
    rows = jnp.pad(rows, ((0, p_pad - P), (0, 0)))
    (w1, b1, wih, bg, w3, b3) = kparams

    out = pl.pallas_call(
        rnn_kernel,
        out_shape=jax.ShapeDtypeStruct((p_pad, NUM_CLASSES), jnp.float32),
        grid=(p_pad // tp,),
        in_specs=[
            pl.BlockSpec((tp, INPUT_SIZE), lambda i: (i, 0)),            # rows: streamed
            pl.BlockSpec((INPUT_SIZE, HIDDEN1), lambda i: (0, 0)),       # weights: resident
            pl.BlockSpec((1, HIDDEN1), lambda i: (0, 0)),
            pl.BlockSpec((HIDDEN1, 3 * HIDDEN2), lambda i: (0, 0)),
            pl.BlockSpec((1, 3 * HIDDEN2), lambda i: (0, 0)),
            pl.BlockSpec((HIDDEN2, NUM_CLASSES), lambda i: (0, 0)),
            pl.BlockSpec((1, NUM_CLASSES), lambda i: (0, 0)),
        ],
        out_specs=pl.BlockSpec((tp, NUM_CLASSES), lambda i: (i, 0)),     # narrow output
        compiler_params=pltpu.CompilerParams(
            dimension_semantics=("parallel",),       # v7x: shard patient tiles over both TCs
            vmem_limit_bytes=32 * 1024 * 1024,       # ~4-6 MiB used at tp=1024; ample headroom
        ),
    )(rows, w1, b1, wih, bg, w3, b3)
    return out[:P, :]


def reference_forward(x, params):
    """Pure-JAX f32 reference with the literal PyTorch forward semantics."""
    (w1, b1, wih, _whh, bih, bhh, w3, b3) = params
    H = HIDDEN2

    def row_forward(row):
        out = jnp.maximum(row @ w1.T + b1, 0.0)                   # fc1 + ReLU1
        gates = out @ wih.T + bih + bhh                           # hidden=None -> h0 = 0
        i = jax.nn.sigmoid(gates[0 * H:1 * H])
        f = jax.nn.sigmoid(gates[1 * H:2 * H])
        g = jnp.tanh(gates[2 * H:3 * H])
        o = jax.nn.sigmoid(gates[3 * H:4 * H])
        c = f * 0.0 + i * g                                       # c0 = 0
        h = jnp.maximum(o * jnp.tanh(c), 0.0)                     # ReLU2
        return jax.nn.softmax(h @ w3.T + b3, axis=-1)

    return jax.vmap(row_forward)(x[:, -1, :, -1])


def init_params(key):
    # Deterministic PyTorch-style uniform(-1/sqrt(fan_in), 1/sqrt(fan_in)) init,
    # in native PyTorch layouts (weight = [out, in], LSTM gate order i, f, g, o).
    ks = jax.random.split(key, 8)

    def u(k, shape, fan_in):
        bound = 1.0 / float(fan_in) ** 0.5
        return jax.random.uniform(k, shape, jnp.float32, -bound, bound)

    w1 = u(ks[0], (HIDDEN1, INPUT_SIZE), INPUT_SIZE)              # fc1.weight
    b1 = u(ks[1], (HIDDEN1,), INPUT_SIZE)                         # fc1.bias
    wih = u(ks[2], (4 * HIDDEN2, HIDDEN1), HIDDEN2)               # lstm.weight_ih_l0
    whh = u(ks[3], (4 * HIDDEN2, HIDDEN2), HIDDEN2)               # lstm.weight_hh_l0 (unused: h0=0)
    bih = u(ks[4], (4 * HIDDEN2,), HIDDEN2)                       # lstm.bias_ih_l0
    bhh = u(ks[5], (4 * HIDDEN2,), HIDDEN2)                       # lstm.bias_hh_l0
    w3 = u(ks[6], (NUM_CLASSES, HIDDEN2), HIDDEN2)                # fc3.weight
    b3 = u(ks[7], (NUM_CLASSES,), HIDDEN2)                        # fc3.bias
    return (w1, b1, wih, whh, bih, bhh, w3, b3)


if __name__ == "__main__":
    key = jax.random.PRNGKey(0)
    kx, kp = jax.random.split(key)

    P, M, C = 2, 3, 8                                             # patients, mats/patient, cols/mat
    x = jax.random.normal(kx, (P, M, INPUT_SIZE, C), jnp.float32)
    params = init_params(kp)
    kparams = prepare_kernel_params(params)

    out = rnn_forward(x, kparams)
    out = jax.block_until_ready(out)

    assert out.shape == (P, NUM_CLASSES)
    assert bool(jnp.all(jnp.isfinite(out)))
    # softmax rows sum to 1 (approx reciprocal contributes ~1e-4 slack)
    assert jnp.allclose(jnp.sum(out, axis=-1), jnp.ones((P,)), atol=2e-3)
    # matches the f32 PyTorch-semantics reference to bf16-matmul tolerance
    ref = reference_forward(x, params)
    assert jnp.allclose(out, ref, atol=3e-2)
    print("KERNEL_OK")
</pallas_src>

<mosaic_0001>
module attributes {stable_mosaic.version = 11 : i64} {
  func.func @rnn_kernel(%arg0: i32, %arg1: memref<16x16xbf16, #tpu.memory_space<vmem>>, %arg2: memref<16x256xbf16, #tpu.memory_space<vmem>>, %arg3: memref<1x256xf32, #tpu.memory_space<vmem>>, %arg4: memref<256x96xbf16, #tpu.memory_space<vmem>>, %arg5: memref<1x96xf32, #tpu.memory_space<vmem>>, %arg6: memref<32x4xbf16, #tpu.memory_space<vmem>>, %arg7: memref<1x4xf32, #tpu.memory_space<vmem>>, %arg8: memref<16x4xf32, #tpu.memory_space<vmem>>) attributes {dimension_semantics = [#tpu.dimension_semantics<parallel>], iteration_bounds = array<i64: 1>, scalar_prefetch = 0 : i64, scratch_operands = 0 : i64, tpu.core_type = #tpu.core_type<tc>, window_params = [{transform_indices = @transform_0, window_bounds = array<i64: 16, 16>}, {pipeline_mode = #tpu.pipeline_mode<synchronous>, transform_indices = @transform_1, window_bounds = array<i64: 16, 256>}, {pipeline_mode = #tpu.pipeline_mode<synchronous>, transform_indices = @transform_2, window_bounds = array<i64: 1, 256>}, {pipeline_mode = #tpu.pipeline_mode<synchronous>, transform_indices = @transform_3, window_bounds = array<i64: 256, 96>}, {pipeline_mode = #tpu.pipeline_mode<synchronous>, transform_indices = @transform_4, window_bounds = array<i64: 1, 96>}, {pipeline_mode = #tpu.pipeline_mode<synchronous>, transform_indices = @transform_5, window_bounds = array<i64: 32, 4>}, {pipeline_mode = #tpu.pipeline_mode<synchronous>, transform_indices = @transform_6, window_bounds = array<i64: 1, 4>}, {transform_indices = @transform_7, window_bounds = array<i64: 16, 4>}]} {
    %c0 = arith.constant 0 : index
    %c0_0 = arith.constant 0 : index
    %0 = vector.load %arg1[%c0, %c0_0] : memref<16x16xbf16, #tpu.memory_space<vmem>>, vector<16x16xbf16>
    %c0_1 = arith.constant 0 : index
    %c0_2 = arith.constant 0 : index
    %1 = vector.load %arg2[%c0_1, %c0_2] : memref<16x256xbf16, #tpu.memory_space<vmem>>, vector<16x256xbf16>
    %cst = arith.constant dense<0.000000e+00> : vector<16x256xf32>
    %2 = tpu.matmul %0, %1, %cst {dimension_numbers = #tpu.dot_dimension_numbers<[1], [0], [0], [1], [0, 0, 1, 1], [], []>} : vector<16x16xbf16>, vector<16x256xbf16>, vector<16x256xf32> -> vector<16x256xf32>
    %c0_3 = arith.constant 0 : index
    %c0_4 = arith.constant 0 : index
    %3 = vector.load %arg3[%c0_3, %c0_4] : memref<1x256xf32, #tpu.memory_space<vmem>>, vector<1x256xf32>
    %4 = vector.broadcast %3 : vector<1x256xf32> to vector<16x256xf32>
    %5 = arith.addf %2, %4 : vector<16x256xf32>
    %cst_5 = arith.constant 0.000000e+00 : f32
    %6 = vector.broadcast %cst_5 : f32 to vector<16x256xf32>
    %7 = arith.maximumf %5, %6 : vector<16x256xf32>
    %8 = arith.truncf %7 : vector<16x256xf32> to vector<16x256xbf16>
    %c0_6 = arith.constant 0 : index
    %c0_7 = arith.constant 0 : index
    %9 = vector.load %arg4[%c0_6, %c0_7] : memref<256x96xbf16, #tpu.memory_space<vmem>>, vector<256x96xbf16>
    %cst_8 = arith.constant dense<0.000000e+00> : vector<16x96xf32>
    %10 = tpu.matmul %8, %9, %cst_8 {dimension_numbers = #tpu.dot_dimension_numbers<[1], [0], [0], [1], [0, 0, 1, 1], [], []>} : vector<16x256xbf16>, vector<256x96xbf16>, vector<16x96xf32> -> vector<16x96xf32>
    %c0_9 = arith.constant 0 : index
    %c0_10 = arith.constant 0 : index
    %11 = vector.load %arg5[%c0_9, %c0_10] : memref<1x96xf32, #tpu.memory_space<vmem>>, vector<1x96xf32>
    %12 = vector.broadcast %11 : vector<1x96xf32> to vector<16x96xf32>
    %13 = arith.addf %10, %12 : vector<16x96xf32>
    %14 = arith.negf %13 : vector<16x96xf32>
    %15 = math.exp %14 : vector<16x96xf32>
    %cst_11 = arith.constant 1.000000e+00 : f32
    %16 = vector.broadcast %cst_11 : f32 to vector<16x96xf32>
    %17 = arith.addf %16, %15 : vector<16x96xf32>
    %18 = arith.divf %16, %17 : vector<16x96xf32>
    %19 = vector.extract_strided_slice %18 {offsets = [0, 0], sizes = [16, 32], strides = [1, 1]} : vector<16x96xf32> to vector<16x32xf32>
    %20 = vector.extract_strided_slice %18 {offsets = [0, 32], sizes = [16, 32], strides = [1, 1]} : vector<16x96xf32> to vector<16x32xf32>
    %cst_12 = arith.constant 2.000000e+00 : f32
    %21 = vector.broadcast %cst_12 : f32 to vector<16x32xf32>
    %22 = arith.mulf %21, %20 : vector<16x32xf32>
    %cst_13 = arith.constant 1.000000e+00 : f32
    %23 = vector.broadcast %cst_13 : f32 to vector<16x32xf32>
    %24 = arith.subf %22, %23 : vector<16x32xf32>
    %25 = vector.extract_strided_slice %18 {offsets = [0, 64], sizes = [16, 32], strides = [1, 1]} : vector<16x96xf32> to vector<16x32xf32>
    %26 = arith.mulf %19, %24 : vector<16x32xf32>
    %27 = math.tanh %26 : vector<16x32xf32>
    %28 = arith.mulf %25, %27 : vector<16x32xf32>
    %cst_14 = arith.constant 0.000000e+00 : f32
    %29 = vector.broadcast %cst_14 : f32 to vector<16x32xf32>
    %30 = arith.maximumf %28, %29 : vector<16x32xf32>
    %31 = arith.truncf %30 : vector<16x32xf32> to vector<16x32xbf16>
    %c0_15 = arith.constant 0 : index
    %c0_16 = arith.constant 0 : index
    %32 = vector.load %arg6[%c0_15, %c0_16] : memref<32x4xbf16, #tpu.memory_space<vmem>>, vector<32x4xbf16>
    %cst_17 = arith.constant dense<0.000000e+00> : vector<16x4xf32>
    %33 = tpu.matmul %31, %32, %cst_17 {dimension_numbers = #tpu.dot_dimension_numbers<[1], [0], [0], [1], [0, 0, 1, 1], [], []>} : vector<16x32xbf16>, vector<32x4xbf16>, vector<16x4xf32> -> vector<16x4xf32>
    %c0_18 = arith.constant 0 : index
    %c0_19 = arith.constant 0 : index
    %34 = vector.load %arg7[%c0_18, %c0_19] : memref<1x4xf32, #tpu.memory_space<vmem>>, vector<1x4xf32>
    %35 = vector.broadcast %34 : vector<1x4xf32> to vector<16x4xf32>
    %36 = arith.addf %33, %35 : vector<16x4xf32>
    %cst_20 = arith.constant dense<0xFF800000> : vector<16xf32>
    %37 = vector.multi_reduction <maximumf>, %36, %cst_20 [1] : vector<16x4xf32> to vector<16xf32>
    %38 = vector.shape_cast %37 : vector<16xf32> to vector<16x1xf32>
    %39 = vector.broadcast %38 : vector<16x1xf32> to vector<16x4xf32>
    %40 = arith.subf %36, %39 : vector<16x4xf32>
    %41 = math.exp %40 : vector<16x4xf32>
    %cst_21 = arith.constant dense<0.000000e+00> : vector<16xf32>
    %42 = vector.multi_reduction <add>, %41, %cst_21 [1] : vector<16x4xf32> to vector<16xf32>
    %43 = vector.shape_cast %42 : vector<16xf32> to vector<16x1xf32>
    %44 = tpu.reciprocal %43 {approx = true} : vector<16x1xf32> -> vector<16x1xf32>
    %45 = vector.broadcast %44 : vector<16x1xf32> to vector<16x4xf32>
    %46 = arith.mulf %41, %45 : vector<16x4xf32>
    %c0_22 = arith.constant 0 : index
    %c0_23 = arith.constant 0 : index
    %47 = vector.load %arg8[%c0_22, %c0_23] : memref<16x4xf32, #tpu.memory_space<vmem>>, vector<16x4xf32>
    tpu.vector_store %arg8[%c0_22, %c0_23], %46 {strides = array<i32>} : memref<16x4xf32, #tpu.memory_space<vmem>>, vector<16x4xf32>,
    return
  }
  func.func @transform_0(%arg0: i32) -> (i32, i32) {
    %c0_i32 = arith.constant 0 : i32
    %c0_i32_0 = arith.constant 0 : i32
    return %arg0, %c0_i32 : i32, i32
  }
  func.func @transform_1(%arg0: i32) -> (i32, i32) {
    %c0_i32 = arith.constant 0 : i32
    %c0_i32_0 = arith.constant 0 : i32
    %c0_i32_1 = arith.constant 0 : i32
    return %c0_i32, %c0_i32_0 : i32, i32
  }
  func.func @transform_2(%arg0: i32) -> (i32, i32) {
    %c0_i32 = arith.constant 0 : i32
    %c0_i32_0 = arith.constant 0 : i32
    %c0_i32_1 = arith.constant 0 : i32
    return %c0_i32, %c0_i32_0 : i32, i32
  }
  func.func @transform_3(%arg0: i32) -> (i32, i32) {
    %c0_i32 = arith.constant 0 : i32
    %c0_i32_0 = arith.constant 0 : i32
    %c0_i32_1 = arith.constant 0 : i32
    return %c0_i32, %c0_i32_0 : i32, i32
  }
  func.func @transform_4(%arg0: i32) -> (i32, i32) {
    %c0_i32 = arith.constant 0 : i32
    %c0_i32_0 = arith.constant 0 : i32
    %c0_i32_1 = arith.constant 0 : i32
    return %c0_i32, %c0_i32_0 : i32, i32
  }
  func.func @transform_5(%arg0: i32) -> (i32, i32) {
    %c0_i32 = arith.constant 0 : i32
    %c0_i32_0 = arith.constant 0 : i32
    %c0_i32_1 = arith.constant 0 : i32
    return %c0_i32, %c0_i32_0 : i32, i32
  }
  func.func @transform_6(%arg0: i32) -> (i32, i32) {
    %c0_i32 = arith.constant 0 : i32
    %c0_i32_0 = arith.constant 0 : i32
    %c0_i32_1 = arith.constant 0 : i32
    return %c0_i32, %c0_i32_0 : i32, i32
  }
  func.func @transform_7(%arg0: i32) -> (i32, i32) {
    %c0_i32 = arith.constant 0 : i32
    %c0_i32_0 = arith.constant 0 : i32
    return %arg0, %c0_i32 : i32, i32
  }
}

</mosaic_0001>

<bundles_post_ra>
// kernel: rnn_forward.1
= control target key start
LH: loop header
LB: loop body
LE: loop exit
PB: predicated region body
PF: predicated region fallthrough
CT: control target
= control target key end

     0   :  { %vm52_vm0 = vcmask 130048   ;;  %s524_s18 = smov 64   ;;  %vm340_vm9 = vcmask 261120   ;;  %vm358_vm10 = vcmask 31744   ;;  %s655_s1 = inlined_call_operand.vmem [shape: bf16[16,256], index: 1, kind: input, shape index: {}]   ;;  %s656_s0 = inlined_call_operand.vmem [shape: bf16[16,16], index: 0, kind: input, shape index: {}]   ;;  %s657_s3 = inlined_call_operand.vmem [shape: bf16[256,96], index: 3, kind: input, shape index: {}]   ;;  %s658_s4 = inlined_call_operand.vmem [shape: f32[1,96], index: 4, kind: input, shape index: {}]   ;;  %s659_s2 = inlined_call_operand.vmem [shape: f32[1,256], index: 2, kind: input, shape index: {}]   ;;  %s660_s6 = inlined_call_operand.vmem [shape: f32[1,4], index: 6, kind: input, shape index: {}]   ;;  %s661_s5 = inlined_call_operand.vmem [shape: bf16[32,4], index: 5, kind: input, shape index: {}]   ;;  %s662_s7 = inlined_call_operand.vmem [shape: f32[16,4], index: 7, kind: output, shape index: {}]  }
   0x1   :  { %v393_v0 = vld [vmem:[%s655_s1] sm:$0xf]  ;;  %v480_v1 = vld [vmem:[%s655_s1 + $0x4] sm:$0xf0]  ;;  %v479_v2 = vld [vmem:[%s655_s1 + $0x4] sm:$0xf] }
   0x2   :  { %v394_v3 = vor.u32 %v480_v1, %v393_v0  ;;  %v395_v4 = vld [vmem:[%s655_s1 + $0x8] sm:$0xf0]  ;;  %v488_v5 = vld [vmem:[%s657_s3 + $0x38] sm:$0xff]  ;;  %v478_v7 = vld [vmem:[%s656_s0] sm:$0xff] }
   0x3   :  { %v398_v6 = vor.u32 %v479_v2, %v395_v4  ;;  %v496_v8 = vld [vmem:[%s657_s3 + $0x78] sm:$0xff]  ;;  %222 = vmatpush.bf16.msra.mxu2 %v488_v5  ;;  %v487_v9 = vld [vmem:[%s657_s3 + $0x30] sm:$0xff]  ;;  %v486_v11 = vld [vmem:[%s657_s3 + $0x28] sm:$0xff] }
   0x4   :  { %63 = vmatpush.bf16.msra.mxu0 %v394_v3  ;;  %236 = vmatpush.bf16.msra.mxu3 %v496_v8  ;;  %v495_v10 = vld [vmem:[%s657_s3 + $0x70] sm:$0xff]  ;;  %v494_v12 = vld [vmem:[%s657_s3 + $0x68] sm:$0xff]  ;;  %v485_v13 = vld [vmem:[%s657_s3 + $0x20] sm:$0xff] }
   0x5   :  { %77 = vmatpush.bf16.msra.mxu1 %v398_v6  ;;  %v493_v14 = vld [vmem:[%s657_s3 + $0x60] sm:$0xff]  ;;  %v484_v15 = vld [vmem:[%s657_s3 + $0x18] sm:$0xff]  ;;  %v483_v17 = vld [vmem:[%s657_s3 + $0x10] sm:$0xff] }
   0x6   :  { %v492_v16 = vld [vmem:[%s657_s3 + $0x58] sm:$0xff]  ;;  %v491_v18 = vld [vmem:[%s657_s3 + $0x50] sm:$0xff]  ;;  %v482_v19 = vld [vmem:[%s657_s3 + $0x8] sm:$0xff] }
   0x7   :  { %399 = vmatmul.msk.bf16.vlgmr.msra.gmra.mxu0 %vm52_vm0, %v478_v7  ;;  %223 = vmatpush.bf16.msra.mxu2 %v487_v9  ;;  %v490_v20 = vld [vmem:[%s657_s3 + $0x48] sm:$0xff]  ;;  %v481_v21 = vld [vmem:[%s657_s3] sm:$0xff] }
   0x8   :  { %400 = vmatmul.msk.bf16.vlgmr.msra.gmra.mxu1 %vm52_vm0, %v478_v7  ;;  %237 = vmatpush.bf16.msra.mxu3 %v495_v10  ;;  %v489_v22 = vld [vmem:[%s657_s3 + $0x40] sm:$0xff] }
   0x9   :  { %v31_v23 = vld [vmem:[%s659_s2] sm:$0x3] }
   0xa   :  { %v33_v26 = vperm.slane %v31_v23, 0  ;;  %v34_v27 = vperm.slane %v31_v23, 1  ;;  %v501_v40 = vld [vmem:[%s658_s4] ss:$0 sm:$0xff]  ;;  %s523_s4 = smov 96  }
   0xb   :  { %224 = vmatpush.bf16.msra.mxu2 %v486_v11 }
   0xc   :  { %238 = vmatpush.bf16.msra.mxu3 %v494_v12 }
   0xf   :  { %225 = vmatpush.bf16.msra.mxu2 %v485_v13 }
  0x10   :  { %239 = vmatpush.bf16.msra.mxu3 %v493_v14 }
  0x13   :  { %226 = vmatpush.bf16.msra.mxu2 %v484_v15 }
  0x14   :  { %240 = vmatpush.bf16.msra.mxu3 %v492_v16 }
  0x17   :  { %227 = vmatpush.bf16.msra.mxu2 %v483_v17 }
  0x18   :  { %241 = vmatpush.bf16.msra.mxu3 %v491_v18 }
  0x1b   :  { %228 = vmatpush.bf16.msra.mxu2 %v482_v19 }
  0x1c   :  { %242 = vmatpush.bf16.msra.mxu3 %v490_v20 }
  0x1f   :  { %229 = vmatpush.bf16.msra.mxu2 %v481_v21  ;;  %v498_v21 = vld [vmem:[%s661_s5 + $0x8] sm:$0xff] }
  0x20   :  { %243 = vmatpush.bf16.msra.mxu3 %v489_v22  ;;  %350 = vmatpush.bf16.msrb.mxu0 %v498_v21  ;;  %v497_v22 = vld [vmem:[%s661_s5] sm:$0xff] }
  0x24   :  { %351 = vmatpush.bf16.msrb.mxu0 %v497_v22 }
  0x84   :  { %v65_v24 = vpop.f32.mrf.mxu0 }
  0x85   :  { %v79_v25 = vpop.f32.mrf.mxu1  ;;  %v66_v28 = vadd.f32 %v65_v24, %v33_v26 }
  0x86   :  { %v80_v29 = vadd.f32 %v79_v25, %v34_v27 }
  0x87   :  { %v84_v34 = vmax.f32 %v66_v28, 0.0 }
  0x88   :  { %v85_v36 = vmax.f32 %v80_v29, 0.0 }
  0x8c   :  { %v67_v30 = vpop.f32.mrf.mxu0 }
  0x8d   :  { %v68_v31 = vadd.f32 %v67_v30, %v33_v26  ;;  %v81_v32 = vpop.f32.mrf.mxu1 }
  0x8e   :  { %v82_v33 = vadd.f32 %v81_v32, %v34_v27 }
  0x8f   :  { %v86_v35 = vmax.f32 %v68_v31, 0.0  ;;  %v502_v31 = vld [vmem:[%s660_s6] ss:$0 sm:$0xff] }
  0x90   :  { %v87_v37 = vmax.f32 %v82_v33, 0.0 }
  0x91   :  { %v88_v38 = vpack.c.bf16 %v86_v35, %v84_v34 }
  0x92   :  { %v89_v39 = vpack.c.bf16 %v87_v37, %v85_v36 }
  0x93   :  { %230 = vmatmul.bf16.vlgmr.msra.gmra.mxu2 %v88_v38 }
  0x94   :  { %244 = vmatmul.bf16.vlgmr.msra.gmra.mxu3 %v89_v39 }
 0x116   :  { %v231_v41 = vpop.f32.mrf.mxu2 }
 0x117   :  { %v232_v42 = vadd.f32 %v501_v40, %v231_v41  ;;  %v245_v43 = vpop.f32.mrf.mxu3 }
 0x119   :  { %v246_v44 = vadd.f32 %v245_v43, %v232_v42 }
 0x11b   :  { %v465_v45 = vmul.f32 -1.442695, %v246_v44 }
 0x11d   :  { %503 = vpow2.f32 %v465_v45 }
 0x11e   :  { %v233_v46 = vpop.f32.mrf.mxu2 }
 0x11f   :  { %v234_v47 = vadd.f32 %v501_v40, %v233_v46  ;;  %v247_v48 = vpop.f32.mrf.mxu3 }
 0x121   :  { %v248_v49 = vadd.f32 %v247_v48, %v234_v47 }
 0x123   :  { %v504_v50 = vpop.eup %503  ;;  %v466_v51 = vmul.f32 -1.442695, %v248_v49 }
 0x124   :  { %v256_v52 = vadd.f32 1.0, %v504_v50 }
 0x125   :  { %505 = vpow2.f32 %v466_v51 }
 0x126   :  { %507 = vrcp.f32 %v256_v52  ;;  %v269_v58 = vand.u32 2147483648, %v256_v52  ;;  %v267_v60 = vand.u32 2147483647, %v256_v52  ;;  %vm263_vm2 = vweird.f32 %v256_v52 }
 0x128   :  { %v270_v63 = vor.u32 1.1754944e-38, %v269_v58  ;;  %vm268_vm4 = vcmp.eq.f32.partialorder %v267_v60, 8.507059e+37 }
 0x12b   :  { %v506_v53 = vpop.eup %505 }
 0x12c   :  { %v508_v54 = vpop.eup %507  ;;  %v257_v55 = vadd.f32 1.0, %v506_v53 }
 0x12d   :  { %v259_v56 = vmul.f32 %v508_v54, %v256_v52  ;;  %vm264_vm1 = vweird.f32 %v508_v54 }
 0x12e   :  { %509 = vrcp.f32 %v257_v55  ;;  %vm265_vm3 = vmor %vm263_vm2, %vm264_vm1  ;;  %v284_v5 = vand.u32 2147483648, %v257_v55  ;;  %v282_v8 = vand.u32 2147483647, %v257_v55  ;;  %vm278_vm6 = vweird.f32 %v257_v55 }
 0x12f   :  { %v260_v57 = vsub.f32 1.0, %v259_v56 }
 0x130   :  { %v285_v10 = vor.u32 1.1754944e-38, %v284_v5  ;;  %vm283_vm8 = vcmp.eq.f32.partialorder %v282_v8, 8.507059e+37 }
 0x131   :  { %v261_v59 = vmul.f32 %v508_v54, %v260_v57 }
 0x133   :  { %v262_v61 = vadd.f32 %v508_v54, %v261_v59 }
 0x134   :  { %v510_v62 = vpop.eup %509 }
 0x135   :  { %v274_v0 = vmul.f32 %v510_v62, %v257_v55  ;;  %v266_v1 = vsel %vm265_vm3, %v508_v54, %v262_v61  ;;  %vm279_vm5 = vweird.f32 %v510_v62 }
 0x136   :  { %v271_v2 = vsel %vm268_vm4, %v270_v63, %v266_v1  ;;  %vm280_vm7 = vmor %vm278_vm6, %vm279_vm5 }
 0x137   :  { %v275_v3 = vsub.f32 1.0, %v274_v0  ;;  %v288_v4 = vmul.f32 2.0, %v271_v2 }
 0x139   :  { %v467_v6 = vadd.f32 -1.0, %v288_v4  ;;  %v276_v7 = vmul.f32 %v510_v62, %v275_v3 }
 0x13b   :  { %294 = vrot.lane.b32.xlu0 %v467_v6, %s523_s4  ;;  %v277_v9 = vadd.f32 %v510_v62, %v276_v7 }
 0x13d   :  { %v281_v11 = vsel %vm280_vm7, %v510_v62, %v277_v9 }
 0x13e   :  { %v286_v12 = vsel %vm283_vm8, %v285_v10, %v281_v11 }
 0x13f   :  { %v289_v13 = vmul.f32 2.0, %v286_v12 }
 0x141   :  { %v468_v14 = vadd.f32 -1.0, %v289_v13 }
 0x143   :  { %296 = vrot.lane.b32.xlu0 %v468_v14, %s523_s4 }
 0x1ad   :  { %v295_v15 = vpop.permute.xlu0 %294 }
 0x1ae   :  { %v300_v16 = vmul.f32 %v295_v15, %v271_v2 }
 0x1b0   :  { %511 = vtanh.f32 %v300_v16 }
 0x1b5   :  { %v297_v17 = vpop.permute.xlu0 %296 }
 0x1b6   :  { %v512_v18 = vpop.eup %511  ;;  %v301_v19 = vmul.f32 %v297_v17, %v286_v12 }
 0x1b7   :  { %306 = vrot.lane.b32.xlu1 %v512_v18, %s524_s18 }
 0x1b8   :  { %513 = vtanh.f32 %v301_v19 }
 0x1be   :  { %v514_v20 = vpop.eup %513 }
 0x1bf   :  { %308 = vrot.lane.b32.xlu1 %v514_v20, %s524_s18 }
 0x229   :  { %v307_v23 = vpop.permute.xlu1 %306 }
 0x22a   :  { %v312_v24 = vmul.f32 %v307_v23, %v271_v2 }
 0x22c   :  { %v314_v27 = vmax.f32 %v312_v24, 0.0 }
 0x231   :  { %v309_v25 = vpop.permute.xlu1 %308 }
 0x232   :  { %v313_v26 = vmul.f32 %v309_v25, %v286_v12 }
 0x234   :  { %v315_v28 = vmax.f32 %v313_v26, 0.0 }
 0x236   :  { %v316_v29 = vpack.c.bf16 %v315_v28, %v314_v27 }
 0x238   :  { %326 = vrot.lane.b32.xlu2 %v316_v29, %s524_s18 }
 0x292   :  { %v327_v30 = vpop.permute.xlu2 %326 }
 0x293   :  { %477 = vmatmul.msk.bf16.vlgmr.msrb.gmra.mxu0 %vm340_vm9, %v327_v30 }
 0x310   :  { %v353_v32 = vpop.f32.mrf.mxu0 }
 0x311   :  { %v354_v33 = vadd.f32 %v502_v31, %v353_v32 }
 0x313   :  { %v359_v34 = vsel %vm358_vm10, %v354_v33, -inf }
 0x314   :  { %360 = vmax.xlane.f32.xlu2 %v359_v34 }
 0x318   :  { %v355_v35 = vpop.f32.mrf.mxu0 }
 0x319   :  { %v356_v36 = vadd.f32 %v502_v31, %v355_v35 }
 0x31b   :  { %v362_v37 = vsel %vm358_vm10, %v356_v36, -inf }
 0x31c   :  { %363 = vmax.xlane.f32.xlu0 %v362_v37 }
 0x387   :  { %v361_v38 = vpop.xlane.xlu2 %360 }
 0x388   :  { %v365_v39 = vsub.f32 %v354_v33, %v361_v38 }
 0x38a   :  { %v367_v40 = vmul.f32 1.442695, %v365_v39 }
 0x38c   :  { %515 = vpow2.f32 %v367_v40 }
 0x38f   :  { %v364_v41 = vpop.xlane.xlu0 %363 }
 0x390   :  { %v366_v42 = vsub.f32 %v356_v36, %v364_v41 }
 0x392   :  { %v516_v43 = vpop.eup %515  ;;  %v369_v44 = vmul.f32 1.442695, %v366_v42 }
 0x393   :  { %v371_v45 = vsel %vm358_vm10, %v516_v43, 0.0 }
 0x394   :  { %517 = vpow2.f32 %v369_v44  ;;  %372 = vadd.xlane.f32.xlu1 %v371_v45 }
 0x39a   :  { %v518_v46 = vpop.eup %517 }
 0x39b   :  { %v374_v47 = vsel %vm358_vm10, %v518_v46, 0.0 }
 0x39c   :  { %375 = vadd.xlane.f32.xlu2 %v374_v47 }
 0x407   :  { %v373_v48 = vpop.xlane.xlu1 %372 }
 0x408   :  { %519 = vrcp.f32 %v373_v48 }
 0x40e   :  { %v520_v49 = vpop.eup %519 }
 0x40f   :  { %v379_v50 = vmul.f32 %v520_v49, %v516_v43  ;;  %v376_v51 = vpop.xlane.xlu2 %375 }
 0x410   :  { %521 = vrcp.f32 %v376_v51 }
 0x411   :  { %381 = vst.msk [vmem:[%s662_s7] sm:$0xff] %vm358_vm10, %v379_v50 }
 0x416   :  { %v522_v52 = vpop.eup %521 }
 0x417   :  { %v380_v53 = vmul.f32 %v522_v52, %v518_v46 }
 0x419   :  { %382 = vst.msk [vmem:[%s662_s7 + $0x8] sm:$0xff] %vm358_vm10, %v380_v53 }

</bundles_post_ra>
